<compile_context>
chip_gen: v6e
topology: v6e:2x2x1
jax: 0.10.0
libtpu: 0.0.40
codegen_flags: <defaults>
</compile_context>

<pallas_src>
import functools

import jax
import jax.numpy as jnp
from jax.experimental import pallas as pl
from jax.experimental.pallas import tpu as pltpu


def _eawmse_kernel(yp_ref, yt_ref, out_ref, *, epsilon, a, threshold):
    yp = yp_ref[...]                                   # (TB, L), native dtype
    yt = yt_ref[...]
    L = yp.shape[-1]

    # ---- mask / index path in the native dtype (bf16 stays packed) --------
    abs_p = jnp.abs(yp)
    abs_t = jnp.abs(yt)
    max_p = jnp.max(abs_p, axis=-1, keepdims=True)     # (TB, 1)
    max_t = jnp.max(abs_t, axis=-1, keepdims=True)     # (TB, 1)

    # Per-row scalar work is done in f32 (cheap: block_b ops per step).
    maxp_f = max_p.astype(jnp.float32) + jnp.float32(epsilon)
    maxt_f = max_t.astype(jnp.float32) + jnp.float32(epsilon)
    thr_p = (jnp.float32(threshold) * maxp_f).astype(yp.dtype)   # (TB, 1)
    thr_t = (jnp.float32(threshold) * maxt_f).astype(yt.dtype)   # (TB, 1)

    mask = (abs_p > thr_p) | (abs_t > thr_t)           # (TB, L) bool

    # (1, L) iota; everything below broadcasts against it.
    idx = jax.lax.broadcasted_iota(jnp.int32, (1, L), 1)

    # torch argmax(mask.float(), dim=1) == first True index, or 0 if none.
    first = jnp.min(jnp.where(mask, idx, jnp.int32(L)), axis=-1, keepdims=True)
    # torch: L - argmax(flip(mask)) - 1 == last True index, or L-1 if none.
    last = jnp.max(jnp.where(mask, idx, jnp.int32(-1)), axis=-1, keepdims=True)

    idx_start = jnp.where(first == L, jnp.int32(0), first)        # (TB, 1)
    idx_end = jnp.where(last == -1, jnp.int32(L - 1), last)       # (TB, 1)

    # Contiguous-range membership with one unsigned compare:
    #   start <= idx <= end  <=>  uint(idx - start) <= uint(end - start).
    span = pltpu.bitcast(idx - idx_start, jnp.uint32)              # (TB, L)
    width = pltpu.bitcast(idx_end - idx_start, jnp.uint32)         # (TB, 1)
    mask_eff = span <= width                                       # (TB, L)

    # ---- squared-error path in f32 ----------------------------------------
    diff = yp.astype(jnp.float32) - yt.astype(jnp.float32)
    err_sum = jnp.sum(jnp.where(mask_eff, diff * diff, 0.0),
                      axis=-1, keepdims=True)                      # (TB, 1)

    # Effective mask is a contiguous range -> count is arithmetic and >= 1
    # (empty-mask rows fall back to the full [0, L-1] range): no clamp, no
    # extra cross-lane reduction.
    counts = (idx_end - idx_start + 1).astype(jnp.float32)         # (TB, 1)

    # weight = (max|y_true| + eps)^a ;  1/weight^2 = exp(-2a * log(max_t)).
    # One EUP transcendental per row instead of a (TB, L) per-element divide.
    inv_w2 = jnp.exp(jnp.float32(-2.0 * a) * jnp.log(maxt_f))      # (TB, 1)

    # Per-row finalize: (TB, 1) ops only -> exact divide.
    out_ref[...] = err_sum * inv_w2 / counts


def _vmem_capacity_bytes():
    """Per-core VMEM capacity; conservative (v7x) fallback if unavailable."""
    try:
        return int(pltpu.get_tpu_info().vmem_capacity_bytes)
    except Exception:
        return 64 * 1024 * 1024


# Estimated number of concurrently-live full-width f32 temporaries inside the
# traced body (upcasts, abs, where-selects, diff, d^2, masks), used so the
# tile budget accounts for more than just the pipeline buffers.
_TEMPS_F32_PER_ROW = 8


def _pick_tiling(B, L, dtype):
    """Batch tile + vmem limit: generation- and dtype-aware."""
    itemsize = jnp.dtype(dtype).itemsize
    sublane = max(8, 32 // itemsize)          # 8 f32, 16 bf16, 32 int8/fp8
    capacity = _vmem_capacity_bytes()

    # VMEM bytes per batch-row: 2 inputs x 2 pipeline buffers (native dtype)
    # plus ~8 full-width f32 in-kernel temporaries.
    per_row = 2 * 2 * L * itemsize + _TEMPS_F32_PER_ROW * L * 4
    budget = capacity // 2                    # keep half of VMEM as headroom

    block_b = max(sublane, (budget // per_row) // sublane * sublane)
    # Never bigger than the (sublane-aligned) batch itself.
    block_b = min(block_b, pl.cdiv(B, sublane) * sublane)

    # Prefer >= 4 grid steps (>= 2 per v7x TensorCore) so each core keeps
    # DMA/compute overlap, as long as tiles stay sublane-aligned.
    while pl.cdiv(B, block_b) < 4 and block_b >= 2 * sublane:
        block_b = max(sublane, (block_b // 2) // sublane * sublane)

    vmem_limit = (capacity * 3) // 4
    return block_b, vmem_limit

    # TODO(synk): for extreme L where even a `sublane`-row tile exceeds VMEM,
    # chunk L inside the kernel with running max / running sum.


def effective_amplitude_weighted_mse_loss(y_pred, y_true,
                                          epsilon=1e-6, a=0.8, threshold=1e-3,
                                          block_b=None):
    """Pallas implementation of EffectiveAmplitudeWeightedMSELoss.forward."""
    assert y_pred.shape == y_true.shape and y_pred.ndim == 2
    B, L = y_pred.shape

    auto_block, vmem_limit = _pick_tiling(B, L, y_pred.dtype)
    if block_b is None:
        block_b = auto_block

    # Pad the batch with zero rows up to a multiple of the tile.  Padded rows
    # produce exactly 0 loss (err_sum == 0), so summing and dividing by the
    # true B keeps the result unchanged.
    num_tiles = pl.cdiv(B, block_b)
    B_pad = num_tiles * block_b
    if B_pad != B:
        pad = ((0, B_pad - B), (0, 0))
        y_pred = jnp.pad(y_pred, pad)
        y_true = jnp.pad(y_true, pad)

    kernel = functools.partial(_eawmse_kernel,
                               epsilon=epsilon, a=a, threshold=threshold)

    loss_per_sample = pl.pallas_call(
        kernel,
        out_shape=jax.ShapeDtypeStruct((B_pad, 1), jnp.float32),
        grid_spec=pltpu.PrefetchScalarGridSpec(
            num_scalar_prefetch=0,
            grid=(num_tiles,),
            in_specs=[
                pl.BlockSpec((block_b, L), lambda i: (i, 0)),
                pl.BlockSpec((block_b, L), lambda i: (i, 0)),
            ],
            out_specs=pl.BlockSpec((block_b, 1), lambda i: (i, 0)),
        ),
        compiler_params=pltpu.CompilerParams(
            dimension_semantics=("parallel",),
            vmem_limit_bytes=int(vmem_limit)),
    )(y_pred, y_true)

    # Final mean over the true batch (padded rows contribute exactly 0).
    return jnp.sum(loss_per_sample) / jnp.float32(B)


def _reference(y_pred, y_true, epsilon=1e-6, a=0.8, threshold=1e-3):
    """Pure-JAX reference mirroring the PyTorch forward exactly."""
    B, L = y_pred.shape
    abs_p = jnp.abs(y_pred)
    abs_t = jnp.abs(y_true)
    max_p = jnp.max(abs_p, axis=1, keepdims=True) + epsilon
    max_t = jnp.max(abs_t, axis=1, keepdims=True) + epsilon
    mask = (abs_p > threshold * max_p) | (abs_t > threshold * max_t)
    idx_start = jnp.argmax(mask.astype(jnp.float32), axis=1)
    idx_end = L - jnp.argmax(mask[:, ::-1].astype(jnp.float32), axis=1) - 1
    rng = jnp.arange(L)[None, :]
    mask_eff = (rng >= idx_start[:, None]) & (rng <= idx_end[:, None])
    weight = max_t ** a
    nds = ((y_pred - y_true) / weight) ** 2
    masked = nds * mask_eff
    counts = jnp.maximum(jnp.sum(mask_eff, axis=1), 1)
    return jnp.mean(jnp.sum(masked, axis=1) / counts)


if __name__ == "__main__":
    key = jax.random.PRNGKey(0)
    k1, k2, k3, k4 = jax.random.split(key, 4)

    # Case 1: tile-aligned batch.  Synthetic "waveforms": random signal with
    # zero padding at both ends so effective-interval masking is exercised.
    B, L = 16, 512
    col = jnp.arange(L)[None, :]
    env = ((col >= 64) & (col < 448)).astype(jnp.float32)
    y_pred = jax.random.normal(k1, (B, L), dtype=jnp.float32) * env
    y_true = jax.random.normal(k2, (B, L), dtype=jnp.float32) * env

    loss = effective_amplitude_weighted_mse_loss(y_pred, y_true)
    loss = jax.block_until_ready(loss)
    ref = _reference(y_pred, y_true)
    assert jnp.allclose(loss, ref, rtol=1e-5, atol=1e-6), (loss, ref)

    # Case 2: unaligned batch (exercises the zero-row padding path).
    B2, L2 = 10, 384
    col2 = jnp.arange(L2)[None, :]
    env2 = ((col2 >= 32) & (col2 < 352)).astype(jnp.float32)
    yp2 = jax.random.normal(k3, (B2, L2), dtype=jnp.float32) * env2
    yt2 = jax.random.normal(k4, (B2, L2), dtype=jnp.float32) * env2

    loss2 = effective_amplitude_weighted_mse_loss(yp2, yt2)
    loss2 = jax.block_until_ready(loss2)
    ref2 = _reference(yp2, yt2)
    assert jnp.allclose(loss2, ref2, rtol=1e-5, atol=1e-6), (loss2, ref2)

    print("KERNEL_OK")
</pallas_src>

<mosaic_0001>
module attributes {stable_mosaic.version = 11 : i64} {
  func.func @_eawmse_kernel(%arg0: i32, %arg1: memref<8x512xf32, #tpu.memory_space<vmem>>, %arg2: memref<8x512xf32, #tpu.memory_space<vmem>>, %arg3: memref<8x1xf32, #tpu.memory_space<vmem>>) attributes {dimension_semantics = [#tpu.dimension_semantics<parallel>], iteration_bounds = array<i64: 2>, scalar_prefetch = 0 : i64, scratch_operands = 0 : i64, tpu.core_type = #tpu.core_type<tc>, window_params = [{transform_indices = @transform_0, window_bounds = array<i64: 8, 512>}, {transform_indices = @transform_1, window_bounds = array<i64: 8, 512>}, {transform_indices = @transform_2, window_bounds = array<i64: 8, 1>}]} {
    %c0 = arith.constant 0 : index
    %c0_0 = arith.constant 0 : index
    %0 = vector.load %arg1[%c0, %c0_0] : memref<8x512xf32, #tpu.memory_space<vmem>>, vector<8x512xf32>
    %c0_1 = arith.constant 0 : index
    %c0_2 = arith.constant 0 : index
    %1 = vector.load %arg2[%c0_1, %c0_2] : memref<8x512xf32, #tpu.memory_space<vmem>>, vector<8x512xf32>
    %2 = math.absf %0 : vector<8x512xf32>
    %3 = math.absf %1 : vector<8x512xf32>
    %cst = arith.constant dense<0xFF800000> : vector<8xf32>
    %4 = vector.multi_reduction <maximumf>, %2, %cst [1] : vector<8x512xf32> to vector<8xf32>
    %5 = vector.shape_cast %4 : vector<8xf32> to vector<8x1xf32>
    %cst_3 = arith.constant dense<0xFF800000> : vector<8xf32>
    %6 = vector.multi_reduction <maximumf>, %3, %cst_3 [1] : vector<8x512xf32> to vector<8xf32>
    %7 = vector.shape_cast %6 : vector<8xf32> to vector<8x1xf32>
    %cst_4 = arith.constant 9.99999997E-7 : f32
    %8 = vector.broadcast %cst_4 : f32 to vector<8x1xf32>
    %9 = arith.addf %5, %8 : vector<8x1xf32>
    %cst_5 = arith.constant 9.99999997E-7 : f32
    %10 = vector.broadcast %cst_5 : f32 to vector<8x1xf32>
    %11 = arith.addf %7, %10 : vector<8x1xf32>
    %cst_6 = arith.constant 1.000000e-03 : f32
    %12 = vector.broadcast %cst_6 : f32 to vector<8x1xf32>
    %13 = arith.mulf %12, %9 : vector<8x1xf32>
    %cst_7 = arith.constant 1.000000e-03 : f32
    %14 = vector.broadcast %cst_7 : f32 to vector<8x1xf32>
    %15 = arith.mulf %14, %11 : vector<8x1xf32>
    %16 = vector.broadcast %13 : vector<8x1xf32> to vector<8x512xf32>
    %17 = arith.cmpf ogt, %2, %16 : vector<8x512xf32>
    %18 = vector.broadcast %15 : vector<8x1xf32> to vector<8x512xf32>
    %19 = arith.cmpf ogt, %3, %18 : vector<8x512xf32>
    %20 = arith.ori %17, %19 : vector<8x512xi1>
    %21 = tpu.iota {dimensions = array<i32: 1>} : vector<1x512xi32>
    %c512_i32 = arith.constant 512 : i32
    %22 = vector.shape_cast %21 : vector<1x512xi32> to vector<1x512xi32>
    %23 = vector.broadcast %22 : vector<1x512xi32> to vector<8x512xi32>
    %24 = vector.broadcast %c512_i32 : i32 to vector<8x512xi32>
    %25 = arith.select %20, %23, %24 : vector<8x512xi1>, vector<8x512xi32>
    %cst_8 = arith.constant dense<2147483647> : vector<8xi32>
    %26 = vector.multi_reduction <minsi>, %25, %cst_8 [1] : vector<8x512xi32> to vector<8xi32>
    %27 = vector.shape_cast %26 : vector<8xi32> to vector<8x1xi32>
    %c-1_i32 = arith.constant -1 : i32
    %28 = vector.shape_cast %21 : vector<1x512xi32> to vector<1x512xi32>
    %29 = vector.broadcast %28 : vector<1x512xi32> to vector<8x512xi32>
    %30 = vector.broadcast %c-1_i32 : i32 to vector<8x512xi32>
    %31 = arith.select %20, %29, %30 : vector<8x512xi1>, vector<8x512xi32>
    %cst_9 = arith.constant dense<-2147483648> : vector<8xi32>
    %32 = vector.multi_reduction <maxsi>, %31, %cst_9 [1] : vector<8x512xi32> to vector<8xi32>
    %33 = vector.shape_cast %32 : vector<8xi32> to vector<8x1xi32>
    %c512_i32_10 = arith.constant 512 : i32
    %34 = vector.broadcast %c512_i32_10 : i32 to vector<8x1xi32>
    %35 = arith.cmpi eq, %27, %34 : vector<8x1xi32>
    %c0_i32 = arith.constant 0 : i32
    %36 = vector.broadcast %c0_i32 : i32 to vector<8x1xi32>
    %37 = arith.select %35, %36, %27 : vector<8x1xi1>, vector<8x1xi32>
    %c-1_i32_11 = arith.constant -1 : i32
    %38 = vector.broadcast %c-1_i32_11 : i32 to vector<8x1xi32>
    %39 = arith.cmpi eq, %33, %38 : vector<8x1xi32>
    %c511_i32 = arith.constant 511 : i32
    %40 = vector.broadcast %c511_i32 : i32 to vector<8x1xi32>
    %41 = arith.select %39, %40, %33 : vector<8x1xi1>, vector<8x1xi32>
    %42 = vector.broadcast %21 : vector<1x512xi32> to vector<8x512xi32>
    %43 = vector.broadcast %37 : vector<8x1xi32> to vector<8x512xi32>
    %44 = arith.subi %42, %43 : vector<8x512xi32>
    %45 = tpu.bitcast %44 : vector<8x512xi32> -> vector<8x512xi32>
    %46 = arith.subi %41, %37 : vector<8x1xi32>
    %47 = tpu.bitcast %46 : vector<8x1xi32> -> vector<8x1xi32>
    %48 = vector.broadcast %47 : vector<8x1xi32> to vector<8x512xi32>
    %49 = arith.cmpi ule, %45, %48 : vector<8x512xi32>
    %50 = arith.subf %0, %1 : vector<8x512xf32>
    %51 = arith.mulf %50, %50 : vector<8x512xf32>
    %cst_12 = arith.constant 0.000000e+00 : f32
    %52 = vector.broadcast %cst_12 : f32 to vector<8x512xf32>
    %53 = arith.select %49, %51, %52 : vector<8x512xi1>, vector<8x512xf32>
    %cst_13 = arith.constant dense<0.000000e+00> : vector<8xf32>
    %54 = vector.multi_reduction <add>, %53, %cst_13 [1] : vector<8x512xf32> to vector<8xf32>
    %55 = vector.shape_cast %54 : vector<8xf32> to vector<8x1xf32>
    %56 = arith.subi %41, %37 : vector<8x1xi32>
    %c1_i32 = arith.constant 1 : i32
    %57 = vector.broadcast %c1_i32 : i32 to vector<8x1xi32>
    %58 = arith.addi %56, %57 : vector<8x1xi32>
    %59 = arith.sitofp %58 : vector<8x1xi32> to vector<8x1xf32>
    %60 = math.log %11 : vector<8x1xf32>
    %cst_14 = arith.constant -1.600000e+00 : f32
    %61 = vector.broadcast %cst_14 : f32 to vector<8x1xf32>
    %62 = arith.mulf %61, %60 : vector<8x1xf32>
    %63 = math.exp %62 : vector<8x1xf32>
    %64 = arith.mulf %55, %63 : vector<8x1xf32>
    %65 = arith.divf %64, %59 : vector<8x1xf32>
    %c0_15 = arith.constant 0 : index
    %c0_16 = arith.constant 0 : index
    %66 = vector.load %arg3[%c0_15, %c0_16] : memref<8x1xf32, #tpu.memory_space<vmem>>, vector<8x1xf32>
    tpu.vector_store %arg3[%c0_15, %c0_16], %65 {strides = array<i32>} : memref<8x1xf32, #tpu.memory_space<vmem>>, vector<8x1xf32>,
    return
  }
  func.func @transform_0(%arg0: i32) -> (i32, i32) {
    %c0_i32 = arith.constant 0 : i32
    %c0_i32_0 = arith.constant 0 : i32
    return %arg0, %c0_i32 : i32, i32
  }
  func.func @transform_1(%arg0: i32) -> (i32, i32) {
    %c0_i32 = arith.constant 0 : i32
    %c0_i32_0 = arith.constant 0 : i32
    return %arg0, %c0_i32 : i32, i32
  }
  func.func @transform_2(%arg0: i32) -> (i32, i32) {
    %c0_i32 = arith.constant 0 : i32
    %c0_i32_0 = arith.constant 0 : i32
    return %arg0, %c0_i32 : i32, i32
  }
}

</mosaic_0001>

<bundles_post_ra>
// kernel: tpu_custom_call.1
= control target key start
LH: loop header
LB: loop body
LE: loop exit
PB: predicated region body
PF: predicated region fallthrough
CT: control target
= control target key end

     0   :  { %7 = vsyncpa [#allocation3], 0  ;;  %s814_s0 = inlined_call_operand.hbm [shape: f32[16,512], index: 0, kind: input, shape index: {}]   ;;  %s815_s1 = inlined_call_operand.hbm [shape: f32[16,512], index: 1, kind: input, shape index: {}]   ;;  %s816_s2 = inlined_call_operand.vmem [shape: f32[16,1], index: 2, kind: output, shape index: {}]  }
   0x1   :  { %9 = vsyncpa [#allocation3 + $0x1], 0 }
   0x2   :  { %10 = vsyncpa [#allocation5], 0 }
   0x3   :  { %12 = vsyncpa [#allocation5 + $0x1], 0  ;;  %s603_s9 = smov 0   ;;  %s605_s10 = smov 0  }
   0x4   :  { %s607_s11 = smov 0   ;;  %s609_s12 = smov 0  }
   0x5 LB: > { %s622_s13 = sadd.s32 4294967295, %s584_s12   ;;  %s625_s14 = sadd.s32 1, %s584_s12   ;;  %s584_s12 = sphi %s609_s12, %s832_s12   ;;  %s580_s11 = sphi %s607_s11, %s831_s11   ;;  %s576_s10 = sphi %s605_s10, %s830_s10   ;;  %s572_s9 = sphi %s603_s9, %s829_s9  }
   0x6   : > { %s22_s15 = ssub.s32 %s584_s12, %s625_s14  ;;  %s25_s16 = sadd.s32 1, %s580_s11 }
   0x7   : > { %p23_p0 = scmp.eq.s32.totalorder %s22_s15, 0  ;;  %p32_p1 = scmp.ne.s32.totalorder %s580_s11, %s576_s10 }
   0x8   : > { %p33_p2 = scmp.eq.s32.totalorder %s584_s12, 0  ;;  %p38_p3 = scmp.ne.s32.totalorder %s576_s10, %s572_s9 }
   0x9   : > { %s635_s17 = scalar_select %p23_p0, %s580_s11, %s25_s16  }
   0xa   : > { %p34_p4 = por %p33_p2, %p32_p1  ;;  %p39_p5 = scmp.eq.s32.totalorder %s622_s13, 0 }
   0xb   : > { %p451_p6 = scmp.lt.s32.totalorder %s584_s12, 2  ;;  %s644_s19 = sand.u32 1, %s580_s11  }
   0xc   : > { %p639_p7 = por %p39_p5, %p38_p3  ;;  %s426_s20 = sshll.u32 %s644_s19, 5 }
   0xd   : > { %s438_s21 = sshll.u32 %s584_s12, 9  ;;  %s118_s25 = scalar_lea.vmem [#allocation2], %s426_s20 }
   0xe   : > { %s818_s18 = scalar_select %p639_p7, 1, 0 }
   0xf   : > { %s653_s24 = scalar_lea.hbm %s814_s0, %s438_s21  ;;  %s126_s26 = sshll.u32 %s118_s25, 4  ;;  %s657_s26 = int_to_ptr.vmem [resolvable:$true] %s126_s26 }
  0x10   : > { %p659_p8 = pnand %p451_p6, %p34_p4  ;;  %s115_s28 = scalar_lea.sflag [#allocation3], %s644_s19 }
  0x11   : > { %s490_s29 = scalar_lea.hbm %s653_s24, 512  ;;  %s495_s4 = scalar_lea.hbm %s814_s0, 1024 }
  0x12   : > { %p491_p11 = scmp.ne.s32.totalorder %s653_s24, %s490_s29  ;;  %p492_p12 = pneg %p659_p8 }
  0x13   : > { %p496_p1 = scmp.lt.s32.totalorder %s653_s24, %s814_s0  ;;  %p497_p2 = scmp.lt.s32.totalorder %s495_s4, %s490_s29 }
  0x14   : > { %p493_p13 = pnand %p492_p12, %p491_p11 }
  0x15   : > { %p498_p3 = por %p497_p2, %p496_p1 }
  0x16   : > { %p494_p0 = pneg %p493_p13 }
  0x18   : > { %p499_p4 = pnand %p498_p3, %p494_p0 }
  0x1a   : > { %502 = shalt.err (!%p499_p4)
}
  0x1b   : > { %s503_s7 = scalar_lea.vmem %s657_s26, 512  ;;  %s586_s8 = smov [#allocation2]  }
  0x1c   : > { %p504_p5 = scmp.ne.s32.totalorder %s657_s26, %s503_s7  ;;  %s508_s9 = sshll.u32 %s586_s8, 4  ;;  %s509_s9 = int_to_ptr.vmem [resolvable:$false] %s508_s9 }
  0x1d   : > { %s510_s15 = scalar_lea.vmem %s509_s9, 1024  ;;  %p511_p13 = scmp.lt.s32.totalorder %s657_s26, %s509_s9 }
  0x1e   : > { %p506_p6 = pnand %p504_p5, %p492_p12  ;;  %p512_p9 = scmp.lt.s32.totalorder %s510_s15, %s503_s7 }
  0x20   : > { %p507_p11 = pneg %p506_p6  ;;  %p513_p10 = por %p512_p9, %p511_p13 }
  0x22   : > { %p514_p1 = pnand %p513_p10, %p507_p11 }
  0x24   : > { %517 = shalt.err (!%p514_p1)
}
  0x25   : > { %447 = dma.hbm_to_vmem [thread:$0]  (!%p659_p8), %s653_s24, 512, %s657_s26, %s115_s28  }
  0x26   : > { %p820_p0 = scmp.lt.s32.totalorder %s584_s12, 3  ;;  %p821_p2 = scmp.ge.s32.totalorder %s584_s12, 1 }
  0x27   : > { %s703_s25 = scalar_lea.hbm %s815_s1, %s438_s21  ;;  %s137_s29 = scalar_lea.vmem [#allocation4], %s426_s20 }
  0x28   : > { %p694_p3 = pnand %p821_p2, %p820_p0  ;;  %s145_s30 = sshll.u32 %s137_s29, 4  ;;  %s146_s30 = int_to_ptr.vmem [resolvable:$true] %s145_s30 }
  0x29   : > { %s134_s24 = scalar_lea.sflag [#allocation5], %s644_s19  ;;  %s518_s26 = scalar_lea.hbm %s703_s25, 512 }
  0x2a   : > { %s822_s16 = scalar_select %p694_p3, 1, 0 }
  0x2b   : > { %p519_p9 = scmp.ne.s32.totalorder %s703_s25, %s518_s26  ;;  %s523_s3 = scalar_lea.hbm %s815_s1, 1024 }
  0x2c   : > { %p524_p5 = scmp.lt.s32.totalorder %s703_s25, %s815_s1  ;;  %p525_p6 = scmp.lt.s32.totalorder %s523_s3, %s518_s26 }
  0x2d   : > { %p521_p10 = pnand %p519_p9, %p492_p12 }
  0x2e   : > { %p526_p11 = por %p525_p6, %p524_p5 }
  0x2f   : > { %p522_p4 = pneg %p521_p10 }
  0x31   : > { %p527_p13 = pnand %p526_p11, %p522_p4 }
  0x33   : > { %530 = shalt.err (!%p527_p13)
}
  0x34   : > { %s531_s20 = scalar_lea.vmem %s146_s30, 512  ;;  %s587_s19 = smov [#allocation4]  }
  0x35   : > { %p532_p1 = scmp.ne.s32.totalorder %s146_s30, %s531_s20  ;;  %s536_s5 = sshll.u32 %s587_s19, 4  ;;  %s537_s5 = int_to_ptr.vmem [resolvable:$false] %s536_s5 }
  0x36   : > { %s538_s6 = scalar_lea.vmem %s537_s5, 1024  ;;  %p539_p9 = scmp.lt.s32.totalorder %s146_s30, %s537_s5 }
  0x37   : > { %p534_p0 = pnand %p532_p1, %p492_p12  ;;  %p540_p10 = scmp.lt.s32.totalorder %s538_s6, %s531_s20 }
  0x39   : > { %p535_p2 = pneg %p534_p0  ;;  %p541_p7 = por %p540_p10, %p539_p9 }
  0x3b   : > { %p542_p3 = pnand %p541_p7, %p535_p2 }
  0x3d   : > { %545 = shalt.err (!%p542_p3)
}
  0x3e   : > { %450 = dma.hbm_to_vmem [thread:$0]  (!%p659_p8), %s703_s25, 512, %s146_s30, %s134_s24  }
  0x3f   : > { %p823_p4 = scmp.ne.s32.totalorder %s822_s16, 0 }
  0x40   : > { %s156_s7 = sand.u32 (!%p823_p4), 1, %s576_s10   ;;  %p824_p12 = scmp.ne.s32.totalorder (!%p823_p4), %s818_s18, 0 }
  0x41   : > { %154 = sbr.rel (%p823_p4) target bundleno = 683 (0x2ab), region = 28  ;;  %s433_s8 = sshll.u32 (!%p823_p4), %s156_s7, 5 }
  0x42   : > { %s157_s9 = scalar_lea.sflag (!%p823_p4), [#allocation3], %s156_s7  ;;  %s160_s15 = scalar_lea.vmem (!%p823_p4), [#allocation2], %s433_s8 }
  0x46   : > { %563 = dma.done.wait (%p824_p12), %s157_s9, 512  }
  0x47   : > { %565 = vsyncadd (%p824_p12), %s157_s9, 4294966784  ;;  %s166_s22 = scalar_lea.sflag [#allocation5], %s156_s7  ;;  %s169_s23 = scalar_lea.vmem [#allocation4], %s433_s8 }
  0x48   : > { %567 = dma.done.wait (%p824_p12), %s166_s22, 512  }
  0x49   : > { %569 = vsyncadd (%p824_p12), %s166_s22, 4294966784  ;;  %v198_v0 = vld [vmem:[%s160_s15] sm:$0xff]  ;;  %v199_v1 = vld [vmem:[%s160_s15 + $0x8] sm:$0xff]  ;;  %v240_v26 = vlaneseq  ;;  %p194_p7 = scmp.lt.s32.totalorder %s622_s13, 1 }
  0x4a   : > { %v200_v2 = vld [vmem:[%s160_s15 + $0x10] sm:$0xff]  ;;  %v737_v3 = vld [vmem:[%s160_s15 + $0x18] sm:$0xff]  ;;  %v202_v4 = vld [vmem:[%s169_s23] sm:$0xff]  ;;  %v206_v6 = vand.u32 2147483647, %v198_v0 }
  0x4b   : > { %v203_v5 = vld [vmem:[%s169_s23 + $0x8] sm:$0xff]  ;;  %v204_v7 = vld [vmem:[%s169_s23 + $0x10] sm:$0xff]  ;;  %v207_v8 = vand.u32 2147483647, %v199_v1  ;;  %v208_v9 = vand.u32 2147483647, %v200_v2  ;;  %v739_v10 = vsub.f32 %v198_v0, %v202_v4 }
  0x4c   : > { %v741_v11 = vsub.f32 %v199_v1, %v203_v5  ;;  %v743_v12 = vld [vmem:[%s169_s23 + $0x18] sm:$0xff]  ;;  %v209_v13 = vand.u32 2147483647, %v737_v3  ;;  %v746_v14 = vsub.f32 %v200_v2, %v204_v7  ;;  %v210_v15 = vand.u32 2147483647, %v202_v4  ;;  %s834_s13 = smov (!%p194_p7, %s622_s13), 1 }
  0x4d   : > { %v211_v16 = vand.u32 2147483647, %v203_v5  ;;  %v214_v17 = vmax.f32 %v206_v6, %v207_v8  ;;  %v212_v18 = vand.u32 2147483647, %v204_v7  ;;  %v213_v20 = vand.u32 2147483647, %v743_v12 }
  0x4e   : > { %v215_v19 = vmax.f32 %v208_v9, %v209_v13  ;;  %v749_v29 = vand.u32 127, %v240_v26  ;;  %s435_s18 = sshll.u32 %s834_s13, 3 }
  0x4f   : > { %v219_v21 = vmax.f32 %v210_v15, %v211_v16  ;;  %v220_v23 = vmax.f32 %v212_v18, %v213_v20  ;;  %s197_s25 = scalar_lea.vmem %s816_s2, %s435_s18 }
  0x50   : > { %v216_v22 = vmax.f32 %v214_v17, %v215_v19  ;;  %v755_v33 = vadd.s32 128, %v749_v29  ;;  %v758_v34 = vadd.s32 256, %v749_v29  ;;  %v769_v37 = vadd.s32 384, %v749_v29 }
  0x51   : > { %v221_v24 = vmax.f32 %v219_v21, %v220_v23  ;;  %v311_v17 = vmul.f32 %v741_v11, %v741_v11  ;;  %v309_v19 = vsub.f32 %v737_v3, %v743_v12 }
  0x52   : > { %217 = vmax.xlane.f32.xlu0 %v216_v22 }
  0x53   : > { %v313_v11 = vmul.f32 %v309_v19, %v309_v19 }
  0x56   : > { %222 = vmax.xlane.f32.xlu0 %v221_v24 }
  0xdb   : > { %v218_v25 = vpop.xlane.xlu0 %217 }
  0xdc   : > { %v224_v27 = vadd.f32 1e-06, %v218_v25 }
  0xde   : > { %v226_v30 = vmul.f32 0.001, %v224_v27 }
  0xdf   : > { %v223_v28 = vpop.xlane.xlu0 %222 }
  0xe0   : > { %v751_v31 = vadd.f32 1e-06, %v223_v28  ;;  %vm228_vm0 = vcmp.gt.f32.partialorder %v206_v6, %v226_v30  ;;  %vm229_vm4 = vcmp.gt.f32.partialorder %v207_v8, %v226_v30  ;;  %vm230_vm7 = vcmp.gt.f32.partialorder %v208_v9, %v226_v30 }
  0xe1   : > { %vm231_vm9 = vcmp.gt.f32.partialorder %v209_v13, %v226_v30 }
  0xe2   : > { %v227_v32 = vmul.f32 0.001, %v751_v31  ;;  %484 = vlog2.f32 %v751_v31 }
  0xe4   : > { %vm232_vm1 = vcmp.gt.f32.partialorder %v210_v15, %v227_v32  ;;  %vm233_vm2 = vcmp.gt.f32.partialorder %v211_v16, %v227_v32  ;;  %vm760_vm3 = vcmp.gt.f32.partialorder %v212_v18, %v227_v32  ;;  %vm764_vm5 = vcmp.gt.f32.partialorder %v213_v20, %v227_v32 }
  0xe5   : > { %vm236_vm6 = vmor %vm228_vm0, %vm232_vm1  ;;  %v310_v16 = vmul.f32 %v739_v10, %v739_v10  ;;  %v312_v20 = vmul.f32 %v746_v14, %v746_v14 }
  0xe6   : > { %vm237_vm8 = vmor %vm229_vm4, %vm233_vm2  ;;  %v245_v38 = vsel %vm236_vm6, %v749_v29, 512  ;;  %v269_v39 = vsel %vm236_vm6, %v749_v29, 4294967295 }
  0xe7   : > { %vm238_vm10 = vmor %vm230_vm7, %vm760_vm3  ;;  %v246_v40 = vsel %vm237_vm8, %v755_v33, 512  ;;  %v270_v41 = vsel %vm237_vm8, %v755_v33, 4294967295 }
  0xe8   : > { %vm239_vm11 = vmor %vm231_vm9, %vm764_vm5  ;;  %v247_v42 = vsel %vm238_vm10, %v758_v34, 512  ;;  %vm249_vm12 = vcmp.lt.s32.totalorder %v245_v38, %v246_v40  ;;  %v271_v43 = vsel %vm238_vm10, %v758_v34, 4294967295  ;;  %vm273_vm13 = vcmp.gt.s32.totalorder %v269_v39, %v270_v41 }
  0xe9   : > { %v248_v44 = vsel %vm239_vm11, %v769_v37, 512  ;;  %v250_v45 = vsel %vm249_vm12, %v245_v38, %v246_v40  ;;  %v272_v46 = vsel %vm239_vm11, %v769_v37, 4294967295  ;;  %v274_v47 = vsel %vm273_vm13, %v269_v39, %v270_v41 }
  0xea   : > { %vm251_vm14 = vcmp.lt.s32.totalorder %v247_v42, %v248_v44  ;;  %vm275_vm15 = vcmp.gt.s32.totalorder %v271_v43, %v272_v46  ;;  %vm333_vm10 = vcmask 7168  }
  0xeb   : > { %v252_v48 = vsel %vm251_vm14, %v247_v42, %v248_v44  ;;  %v276_v49 = vsel %vm275_vm15, %v271_v43, %v272_v46 }
  0xec   : > { %vm253_vm0 = vcmp.lt.s32.totalorder %v250_v45, %v252_v48  ;;  %vm277_vm1 = vcmp.gt.s32.totalorder %v274_v47, %v276_v49 }
  0xed   : > { %v254_v50 = vsel %vm253_vm0, %v250_v45, %v252_v48  ;;  %v278_v51 = vsel %vm277_vm1, %v274_v47, %v276_v49 }
  0xee   : > { %v256_v52 = vshra.s32 %v254_v50, 16  ;;  %v280_v54 = vshra.s32 %v278_v51, 16  ;;  %v255_v56 = vand.u32 65535, %v254_v50  ;;  %v279_v59 = vand.u32 65535, %v278_v51 }
  0xf0   : > { %v258_v53 = vcvt.s32.f32 %v256_v52  ;;  %v282_v55 = vcvt.s32.f32 %v280_v54  ;;  %v257_v58 = vcvt.s32.f32 %v255_v56  ;;  %v281_v62 = vcvt.s32.f32 %v279_v59 }
  0xf2   : > { %259 = vmin.xlane.f32.xlu1 %v258_v53 }
  0xf6   : > { %283 = vmax.xlane.f32.xlu1 %v282_v55 }
 0x17b   : > { %v260_v57 = vpop.xlane.xlu1 %259 }
 0x17c   : > { %vm261_vm2 = vcmp.eq.f32.partialorder %v258_v53, %v260_v57  ;;  %v266_v0 = vcvt.f32.s32 %v260_v57 }
 0x17d   : > { %v262_v60 = vsel %vm261_vm2, %v257_v58, inf }
 0x17e   : > { %263 = vmin.xlane.f32.xlu0 %v262_v60  ;;  %v267_v2 = vshll.u32 %v266_v0, 16 }
 0x17f   : > { %v284_v61 = vpop.xlane.xlu1 %283 }
 0x180   : > { %vm285_vm3 = vcmp.eq.f32.partialorder %v282_v55, %v284_v61  ;;  %v290_v4 = vcvt.f32.s32 %v284_v61 }
 0x181   : > { %v286_v63 = vsel %vm285_vm3, %v281_v62, -inf }
 0x182   : > { %287 = vmax.xlane.f32.xlu1 %v286_v63  ;;  %v291_v8 = vshll.u32 %v290_v4, 16 }
 0x207   : > { %v264_v1 = vpop.xlane.xlu0 %263 }
 0x208   : > { %v265_v5 = vcvt.f32.s32 %v264_v1 }
 0x20a   : > { %v268_v6 = vadd.s32 %v267_v2, %v265_v5 }
 0x20b   : > { %v288_v7 = vpop.xlane.xlu1 %287 }
 0x20c   : > { %vm293_vm4 = vcmp.eq.s32.totalorder %v268_v6, 512  ;;  %v289_v9 = vcvt.f32.s32 %v288_v7 }
 0x20d   : > { %v294_v15 = vsel %vm293_vm4, 0, %v268_v6 }
 0x20e   : > { %v292_v13 = vadd.s32 %v291_v8, %v289_v9  ;;  %v297_v22 = vsub.s32 %v749_v29, %v294_v15  ;;  %v298_v23 = vsub.s32 %v755_v33, %v294_v15  ;;  %v299_v24 = vsub.s32 %v758_v34, %v294_v15  ;;  %v485_v29 = vpop.eup %484 }
 0x20f   : > { %v300_v10 = vsub.s32 %v769_v37, %v294_v15  ;;  %v326_v30 = vmul.f32 0.6931472, %v485_v29 }
 0x210   : > { %vm295_vm5 = vcmp.eq.s32.totalorder %v292_v13, 4294967295 }
 0x211   : > { %v296_v18 = vsel %vm295_vm5, 511, %v292_v13  ;;  %v327_v32 = vmul.f32 -1.6, %v326_v30 }
 0x212   : > { %v301_v21 = vsub.s32 %v296_v18, %v294_v15 }
 0x213   : > { %v328_v34 = vmul.f32 1.442695, %v327_v32 }
 0x214   : > { %vm302_vm6 = vcmp.le.u32.totalorder %v297_v22, %v301_v21  ;;  %vm303_vm7 = vcmp.le.u32.totalorder %v298_v23, %v301_v21  ;;  %vm304_vm8 = vcmp.le.u32.totalorder %v299_v24, %v301_v21  ;;  %vm305_vm9 = vcmp.le.u32.totalorder %v300_v10, %v301_v21 }
 0x215   : > { %v314_v25 = vsel %vm302_vm6, %v310_v16, 0.0  ;;  %v315_v26 = vsel %vm303_vm7, %v311_v17, 0.0  ;;  %v316_v27 = vsel %vm304_vm8, %v312_v20, 0.0  ;;  %v317_v14 = vsel %vm305_vm9, %v313_v11, 0.0 }
 0x216   : > { %v318_v3 = vadd.f32 %v315_v26, %v314_v25  ;;  %v323_v33 = vadd.s32 1, %v301_v21  ;;  %486 = vpow2.f32 %v328_v34 }
 0x218   : > { %v319_v12 = vadd.f32 %v318_v3, %v316_v27  ;;  %v324_v35 = vcvt.s32.f32 %v323_v33 }
 0x21a   : > { %v320_v28 = vadd.f32 %v319_v12, %v317_v14  ;;  %488 = vrcp.f32 %v324_v35 }
 0x21c   : > { %321 = vadd.xlane.f32.xlu0 %v320_v28 }
 0x223   : > { %v487_v36 = vpop.eup %486 }
 0x227   : > { %v489_v39 = vpop.eup %488 }
 0x2a5   : > { %v322_v37 = vpop.xlane.xlu0 %321 }
 0x2a6   : > { %v330_v38 = vmul.f32 %v487_v36, %v322_v37 }
 0x2a8   : > { %v332_v31 = vmul.f32 %v489_v39, %v330_v38 }
 0x2aa   : > { %334 = vst.msk [vmem:[%s197_s25] sm:$0xff] %vm333_vm10, %v332_v31 }
 0x2ab PF: > { %p15_p8 = scmp.ge.s32.totalorder %s625_s14, 4   ;;  %s829_s9 = smov %s576_s10 }
 0x2ac   : > { %s830_s10 = smov %s580_s11  ;;  %s831_s11 = smov %s635_s17 }
 0x2ad   : > { %s832_s12 = smov %s625_s14  ;;  %17 = sbr.rel (!%p15_p8) target bundleno = 5 (0x5), region = 81 }
 0x2b2   :  { %354 = vsyncpa [#allocation3], 1 }
 0x2b3   :  { %356 = vsyncpa [#allocation3 + $0x1], 1 }
 0x2b4   :  { %357 = vsyncpa [#allocation5], 1 }
 0x2b5   :  { %359 = vsyncpa [#allocation5 + $0x1], 1 }

</bundles_post_ra>
